<compile_context>
chip_gen: v5e
topology: v5e:2x2
jax: 0.10.0
libtpu: 0.0.40
codegen_flags: <defaults>
</compile_context>

<pallas_src>
import numpy as np
import jax
import jax.numpy as jnp
from jax.experimental import pallas as pl
from jax.experimental.pallas import tpu as pltpu


def _round_up(x, m):
    return (x + m - 1) // m * m


def _obj_kernel(obj_logit_ref, obj_scores_ref, obj_pred_ref):
    """Object branch (one-shot): softmax, zero background, max/argmax over classes 1.."""
    logits = obj_logit_ref[...].astype(jnp.float32)          # (n_obj, c_obj)
    n_obj, c_obj = logits.shape
    m = jnp.max(logits, axis=1, keepdims=True)
    e = jnp.exp(logits - m)
    inv = pl.reciprocal(jnp.sum(e, axis=1, keepdims=True), approx=False)
    prob = e * inv
    col = jax.lax.broadcasted_iota(jnp.int32, (n_obj, c_obj), 1)
    masked = jnp.where(col == 0, jnp.float32(-1.0), prob)    # probs > 0, so -1 is safe
    s = jnp.max(masked, axis=1, keepdims=True)
    is_max = masked >= s
    p = jnp.min(jnp.where(is_max, col, jnp.int32(c_obj)), axis=1, keepdims=True)
    obj_scores_ref[...] = s
    obj_pred_ref[...] = p.astype(jnp.int32)


def _rel_kernel(obj_scores_ref, rel_logit_ref, idx_ref, prob_ref, misc_ref):
    """Relation branch for one lane-dense tile of pairs.

    obj_scores_ref : (n_obj, 1)         per-box score (objects on sublanes)
    rel_logit_ref  : (c_rel, tile)      classes on sublanes, pairs on lanes
    idx_ref        : (2, tile) int32    row0 = subject idx, row1 = object idx
    prob_ref       : (tile, c_rel_pad)  softmax slab, already row-major for consumer
    misc_ref       : (2, tile) f32      row0 = triple score, row1 = rel label (as f32)
    """
    rel_logits = rel_logit_ref[...].astype(jnp.float32)      # (c_rel, tile)
    c_rel, tile = rel_logits.shape
    c_rel_pad = prob_ref.shape[1]

    # label / max-logit path on raw logits (independent of the exp/recip chain)
    rrow = jax.lax.broadcasted_iota(jnp.int32, (c_rel, tile), 0)
    lmasked = jnp.where(rrow == 0, jnp.float32(-jnp.inf), rel_logits)
    lmax = jnp.max(lmasked, axis=0, keepdims=True)            # (1, tile)
    r_is_max = lmasked >= lmax
    rel_c = jnp.min(jnp.where(r_is_max, rrow, jnp.int32(c_rel)), axis=0, keepdims=True)

    # softmax over classes (sublane axis); hoisted exact reciprocal
    rm = jnp.max(rel_logits, axis=0, keepdims=True)
    re = jnp.exp(rel_logits - rm)
    rinv = pl.reciprocal(jnp.sum(re, axis=0, keepdims=True), approx=False)
    rel_prob = re * rinv                                      # (c_rel, tile)
    rel_s = jnp.exp(lmax - rm) * rinv                         # (1, tile) == max prob[1:]

    # in-kernel gather of per-pair subject/object scores: vectorized one-hot reduce
    # over the tiny n_obj sublane axis (no XLA gather between launches).
    obj_s = obj_scores_ref[...]                               # (n_obj, 1)
    n_obj = obj_s.shape[0]
    idx = idx_ref[...]
    idx0 = idx[0:1, :]
    idx1 = idx[1:2, :]
    obj_iota = jax.lax.broadcasted_iota(jnp.int32, (n_obj, tile), 0)
    s0 = jnp.sum(jnp.where(obj_iota == idx0, obj_s, 0.0), axis=0, keepdims=True)
    s1 = jnp.sum(jnp.where(obj_iota == idx1, obj_s, 0.0), axis=0, keepdims=True)

    # prob slab: pad classes to a lane multiple, XLU-transpose, one unmasked store
    pad_rows = c_rel_pad - c_rel
    if pad_rows:
        rel_prob_full = jnp.concatenate(
            [rel_prob, jnp.zeros((pad_rows, tile), jnp.float32)], axis=0)
    else:
        rel_prob_full = rel_prob
    prob_ref[...] = rel_prob_full.T                           # (tile, c_rel_pad)

    triple = rel_s * s0 * s1
    misc_ref[...] = jnp.concatenate([triple, rel_c.astype(jnp.float32)], axis=0)


def post_process_single(obj_logit, rel_logit, rel_pair_idx, *, max_tile=4096):
    """Single-image PostProcessor forward (use_gt_box=True path)."""
    n_obj, c_obj = obj_logit.shape
    n_rel, c_rel = rel_logit.shape
    obj_logit = obj_logit.astype(jnp.float32)

    # ---- object branch: tiny one-shot kernel (out of the tiled grid) ----------
    obj_scores, obj_pred = pl.pallas_call(
        _obj_kernel,
        out_shape=(jax.ShapeDtypeStruct((n_obj, 1), jnp.float32),
                   jax.ShapeDtypeStruct((n_obj, 1), jnp.int32)),
    )(obj_logit)

    # ---- relation branch: fat lane-dense tiles --------------------------------
    n_rel_128 = _round_up(max(n_rel, 1), 128)
    # keep >=2 tiles when there is enough work so "parallel" shards on v7x megacore
    half = _round_up((n_rel_128 + 1) // 2, 128)
    tile_n = max(128, min(max_tile, half))
    n_rel_pad = _round_up(n_rel_128, tile_n)
    num_tiles = n_rel_pad // tile_n
    pad = n_rel_pad - n_rel

    c_rel_pad = _round_up(c_rel, 128)
    rel_logit_t = jnp.pad(rel_logit.astype(jnp.float32), ((0, pad), (0, 0))).T
    idx_pack = jnp.pad(rel_pair_idx.astype(jnp.int32).T, ((0, 0), (0, pad)))

    # VMEM budget: double-buffered in/out blocks + live intermediates; cap stays
    # safe on v7x's 64 MiB physical VMEM.
    c_rel_sub = _round_up(c_rel, 8)
    n_obj_sub = _round_up(n_obj, 8)
    lanes = (2 * c_rel_sub + 2 * 8          # rel logits in, idx in (double-buffered)
             + 2 * c_rel_pad + 2 * 8        # prob out, misc out (double-buffered)
             + 6 * c_rel_sub                # live softmax temporaries
             + 2 * c_rel_pad                # padded prob + its transpose
             + 2 * n_obj_sub)               # one-hot gather temporaries
    vmem_est = 4 * tile_n * lanes + (2 << 20)
    try:
        hard_cap = int(pltpu.get_tpu_info().vmem_capacity_bytes * 3 // 4)
    except Exception:
        hard_cap = 48 << 20
    vmem_bytes = int(min(hard_cap, max(8 << 20, vmem_est)))

    prob_rows, misc = pl.pallas_call(
        _rel_kernel,
        grid=(num_tiles,),
        in_specs=[
            pl.BlockSpec((n_obj, 1), lambda i: (0, 0)),        # resident, tiny
            pl.BlockSpec((c_rel, tile_n), lambda i: (0, i)),
            pl.BlockSpec((2, tile_n), lambda i: (0, i)),
        ],
        out_specs=(
            pl.BlockSpec((tile_n, c_rel_pad), lambda i: (i, 0)),
            pl.BlockSpec((2, tile_n), lambda i: (0, i)),
        ),
        out_shape=(
            jax.ShapeDtypeStruct((n_rel_pad, c_rel_pad), jnp.float32),
            jax.ShapeDtypeStruct((2, n_rel_pad), jnp.float32),
        ),
        compiler_params=pltpu.CompilerParams(
            dimension_semantics=("parallel",),
            vmem_limit_bytes=vmem_bytes),
    )(obj_scores, rel_logit_t, idx_pack)

    obj_scores_1d = obj_scores[:, 0]                    # pred_scores
    obj_labels_1d = obj_pred[:, 0]                      # pred_labels
    # pad columns (zero logits / idx 0) are sliced off BEFORE the sort so they
    # cannot pollute the ordering.
    rel_class_prob = prob_rows[:n_rel, :c_rel]          # already row-major
    triple_scores = misc[0, :n_rel]
    rel_labels = misc[1, :n_rel].astype(jnp.int32)      # small ints: exact f32 roundtrip

    # glue: torch.sort(..., descending=True) equivalent; same permutation reused.
    sorting_idx = jnp.argsort(triple_scores, descending=True)
    return {
        "pred_labels": obj_labels_1d,
        "pred_scores": obj_scores_1d,
        "rel_pair_idxs": rel_pair_idx[sorting_idx],
        "pred_rel_scores": rel_class_prob[sorting_idx],
        "pred_rel_labels": rel_labels[sorting_idx],
    }


def _reference_single(obj_logit, rel_logit, rel_pair_idx):
    """Pure-JAX reference mirroring the PyTorch code (use_gt_box=True)."""
    obj_prob = jax.nn.softmax(obj_logit, -1)
    obj_prob = obj_prob.at[:, 0].set(0.0)
    obj_scores = jnp.max(obj_prob[:, 1:], axis=1)
    obj_pred = jnp.argmax(obj_prob[:, 1:], axis=1) + 1
    s0 = obj_scores[rel_pair_idx[:, 0]]
    s1 = obj_scores[rel_pair_idx[:, 1]]
    rel_prob = jax.nn.softmax(rel_logit, -1)
    rel_scores = jnp.max(rel_prob[:, 1:], axis=1)
    rel_class = jnp.argmax(rel_prob[:, 1:], axis=1) + 1
    triple = rel_scores * s0 * s1
    order = jnp.argsort(triple, descending=True)
    return {
        "pred_labels": obj_pred.astype(jnp.int32),
        "pred_scores": obj_scores,
        "rel_pair_idxs": rel_pair_idx[order],
        "pred_rel_scores": rel_prob[order],
        "pred_rel_labels": rel_class[order].astype(jnp.int32),
    }


if __name__ == "__main__":
    key = jax.random.PRNGKey(0)
    k1, k2 = jax.random.split(key, 2)

    n_obj, c_obj = 8, 16        # num boxes, num object classes (incl. background)
    c_rel = 8                   # num predicate classes (incl. background)
    pairs = np.array([[i, j] for i in range(n_obj) for j in range(n_obj) if i != j],
                     dtype=np.int32)
    n_rel = pairs.shape[0]      # n_obj * (n_obj - 1) = 56 (gt-box relation pairs)

    obj_logit = jax.random.normal(k1, (n_obj, c_obj), jnp.float32)
    rel_logit = jax.random.normal(k2, (n_rel, c_rel), jnp.float32)
    rel_pair_idx = jnp.asarray(pairs)

    out = post_process_single(obj_logit, rel_logit, rel_pair_idx)
    out = jax.tree_util.tree_map(jax.block_until_ready, out)

    ref = _reference_single(obj_logit, rel_logit, rel_pair_idx)
    np.testing.assert_allclose(np.asarray(out["pred_scores"]),
                               np.asarray(ref["pred_scores"]), rtol=1e-5, atol=1e-6)
    np.testing.assert_array_equal(np.asarray(out["pred_labels"]),
                                  np.asarray(ref["pred_labels"]))
    np.testing.assert_allclose(np.asarray(out["pred_rel_scores"]),
                               np.asarray(ref["pred_rel_scores"]), rtol=1e-5, atol=1e-6)
    np.testing.assert_array_equal(np.asarray(out["pred_rel_labels"]),
                                  np.asarray(ref["pred_rel_labels"]))
    np.testing.assert_array_equal(np.asarray(out["rel_pair_idxs"]),
                                  np.asarray(ref["rel_pair_idxs"]))

    print("KERNEL_OK")
</pallas_src>

<mosaic_0001>
module attributes {stable_mosaic.version = 11 : i64} {
  func.func @_obj_kernel(%arg0: memref<8x16xf32, #tpu.memory_space<vmem>>, %arg1: memref<8x1xf32, #tpu.memory_space<vmem>>, %arg2: memref<8x1xi32, #tpu.memory_space<vmem>>) attributes {dimension_semantics = [], scalar_prefetch = 0 : i64, scratch_operands = 0 : i64, tpu.core_type = #tpu.core_type<tc>} {
    %c0 = arith.constant 0 : index
    %c0_0 = arith.constant 0 : index
    %0 = vector.load %arg0[%c0, %c0_0] : memref<8x16xf32, #tpu.memory_space<vmem>>, vector<8x16xf32>
    %cst = arith.constant dense<0xFF800000> : vector<8xf32>
    %1 = vector.multi_reduction <maximumf>, %0, %cst [1] : vector<8x16xf32> to vector<8xf32>
    %2 = vector.shape_cast %1 : vector<8xf32> to vector<8x1xf32>
    %3 = vector.broadcast %2 : vector<8x1xf32> to vector<8x16xf32>
    %4 = arith.subf %0, %3 : vector<8x16xf32>
    %5 = math.exp %4 : vector<8x16xf32>
    %cst_1 = arith.constant dense<0.000000e+00> : vector<8xf32>
    %6 = vector.multi_reduction <add>, %5, %cst_1 [1] : vector<8x16xf32> to vector<8xf32>
    %7 = vector.shape_cast %6 : vector<8xf32> to vector<8x1xf32>
    %8 = tpu.reciprocal %7 : vector<8x1xf32> -> vector<8x1xf32>
    %9 = vector.broadcast %8 : vector<8x1xf32> to vector<8x16xf32>
    %10 = arith.mulf %5, %9 : vector<8x16xf32>
    %11 = tpu.iota {dimensions = array<i32: 1>} : vector<8x16xi32>
    %c0_i32 = arith.constant 0 : i32
    %12 = vector.broadcast %c0_i32 : i32 to vector<8x16xi32>
    %13 = arith.cmpi eq, %11, %12 : vector<8x16xi32>
    %cst_2 = arith.constant -1.000000e+00 : f32
    %14 = vector.broadcast %cst_2 : f32 to vector<8x16xf32>
    %15 = arith.select %13, %14, %10 : vector<8x16xi1>, vector<8x16xf32>
    %cst_3 = arith.constant dense<0xFF800000> : vector<8xf32>
    %16 = vector.multi_reduction <maximumf>, %15, %cst_3 [1] : vector<8x16xf32> to vector<8xf32>
    %17 = vector.shape_cast %16 : vector<8xf32> to vector<8x1xf32>
    %18 = vector.broadcast %17 : vector<8x1xf32> to vector<8x16xf32>
    %19 = arith.cmpf oge, %15, %18 : vector<8x16xf32>
    %c16_i32 = arith.constant 16 : i32
    %20 = vector.broadcast %c16_i32 : i32 to vector<8x16xi32>
    %21 = arith.select %19, %11, %20 : vector<8x16xi1>, vector<8x16xi32>
    %cst_4 = arith.constant dense<2147483647> : vector<8xi32>
    %22 = vector.multi_reduction <minsi>, %21, %cst_4 [1] : vector<8x16xi32> to vector<8xi32>
    %23 = vector.shape_cast %22 : vector<8xi32> to vector<8x1xi32>
    %c0_5 = arith.constant 0 : index
    %c0_6 = arith.constant 0 : index
    %24 = vector.load %arg1[%c0_5, %c0_6] : memref<8x1xf32, #tpu.memory_space<vmem>>, vector<8x1xf32>
    tpu.vector_store %arg1[%c0_5, %c0_6], %17 {strides = array<i32>} : memref<8x1xf32, #tpu.memory_space<vmem>>, vector<8x1xf32>,
    %c0_7 = arith.constant 0 : index
    %c0_8 = arith.constant 0 : index
    %25 = vector.load %arg2[%c0_7, %c0_8] : memref<8x1xi32, #tpu.memory_space<vmem>>, vector<8x1xi32>
    tpu.vector_store %arg2[%c0_7, %c0_8], %23 {strides = array<i32>} : memref<8x1xi32, #tpu.memory_space<vmem>>, vector<8x1xi32>,
    return
  }
}

</mosaic_0001>

<bundles_post_ra>
// kernel: tpu_custom_call.1
= control target key start
LH: loop header
LB: loop body
LE: loop exit
PB: predicated region body
PF: predicated region fallthrough
CT: control target
= control target key end

     0   :  { %8 = vsyncpa [#allocation3], 0  ;;  %s117_s12 = smov [#allocation2]   ;;  %s148_s0 = inlined_call_operand.hbm [shape: f32[8,16], index: 0, kind: input, shape index: {}]   ;;  %s149_s1 = inlined_call_operand.vmem [shape: f32[8,1], index: 1, kind: output, shape index: {0}]   ;;  %s150_s2 = inlined_call_operand.vmem [shape: s32[8,1], index: 2, kind: output, shape index: {1}]  }
   0x1   :  { %s14_s11 = sshll.u32 %s148_s0, 4  ;;  %s16_s13 = sshll.u32 %s117_s12, 4  ;;  %s15_s11 = int_to_ptr.hbm [resolvable:$true] %s14_s11  ;;  %s17_s13 = int_to_ptr.vmem [resolvable:$true] %s16_s13 }
   0x2   :  { %19 = dma.hbm_to_vmem [thread:$0]  %s15_s11, 128, %s17_s13, [#allocation3]  }
   0x3   :  { %115 = dma.done.wait [#allocation3], 128  }
   0x4   :  { %116 = vsyncadd [#allocation3], 4294967168  ;;  %vm25_vm0 = vcmask 130048   ;;  %v24_v0 = vld [vmem:[#allocation2] sm:$0xff]  ;;  %v50_v10 = vlaneseq  ;;  %vm74_vm6 = vcmask 7168  }
   0x5   :  { %v26_v1 = vsel %vm25_vm0, %v24_v0, -inf }
   0x6   :  { %27 = vmax.xlane.f32.xlu0 %v26_v1  ;;  %v51_v15 = vand.u32 127, %v50_v10 }
   0x8   :  { %vm52_vm5 = vcmp.eq.s32.totalorder %v51_v15, 0 }
  0x79   :  { %v28_v2 = vpop.xlane.xlu0 %27 }
  0x7a   :  { %v29_v3 = vsub.f32 %v24_v0, %v28_v2 }
  0x7c   :  { %v30_v4 = vmul.f32 1.442695, %v29_v3 }
  0x7e   :  { %87 = vpow2.f32 %v30_v4 }
  0x84   :  { %v88_v5 = vpop.eup %87 }
  0x85   :  { %v32_v6 = vsel %vm25_vm0, %v88_v5, 0.0 }
  0x86   :  { %33 = vadd.xlane.f32.xlu0 %v32_v6 }
  0xf9   :  { %v34_v7 = vpop.xlane.xlu0 %33 }
  0xfa   :  { %89 = vrcp.f32 %v34_v7  ;;  %v46_v12 = vand.u32 2147483648, %v34_v7  ;;  %v44_v14 = vand.u32 2147483647, %v34_v7  ;;  %vm40_vm2 = vweird.f32 %v34_v7 }
  0xfc   :  { %v47_v17 = vor.u32 1.1754944e-38, %v46_v12  ;;  %vm45_vm4 = vcmp.eq.f32.partialorder %v44_v14, 8.507059e+37 }
 0x100   :  { %v90_v8 = vpop.eup %89 }
 0x101   :  { %v36_v9 = vmul.f32 %v90_v8, %v34_v7  ;;  %vm41_vm1 = vweird.f32 %v90_v8 }
 0x102   :  { %vm42_vm3 = vmor %vm40_vm2, %vm41_vm1 }
 0x103   :  { %v37_v11 = vsub.f32 1.0, %v36_v9 }
 0x105   :  { %v38_v13 = vmul.f32 %v90_v8, %v37_v11 }
 0x107   :  { %v39_v16 = vadd.f32 %v90_v8, %v38_v13 }
 0x109   :  { %v43_v18 = vsel %vm42_vm3, %v90_v8, %v39_v16 }
 0x10a   :  { %v48_v19 = vsel %vm45_vm4, %v47_v17, %v43_v18 }
 0x10b   :  { %v49_v20 = vmul.f32 %v88_v5, %v48_v19 }
 0x10d   :  { %v53_v21 = vsel %vm52_vm5, -1.0, %v49_v20 }
 0x10e   :  { %v54_v22 = vsel %vm25_vm0, %v53_v21, -inf }
 0x10f   :  { %55 = vmax.xlane.f32.xlu1 %v54_v22 }
 0x182   :  { %v56_v23 = vpop.xlane.xlu1 %55 }
 0x183   :  { %vm57_vm7 = vcmp.ge.f32.partialorder %v53_v21, %v56_v23  ;;  %75 = vst.msk [vmem:[%s149_s1] sm:$0xff] %vm74_vm6, %v56_v23 }
 0x184   :  { %v58_v24 = vsel %vm57_vm7, %v51_v15, 16 }
 0x185   :  { %v59_v25 = vsel %vm25_vm0, %v58_v24, 2147483647 }
 0x186   :  { %v61_v26 = vshra.s32 %v59_v25, 16  ;;  %v60_v28 = vand.u32 65535, %v59_v25 }
 0x188   :  { %v63_v27 = vcvt.s32.f32 %v61_v26  ;;  %v62_v30 = vcvt.s32.f32 %v60_v28 }
 0x18a   :  { %64 = vmin.xlane.f32.xlu1 %v63_v27 }
 0x1fd   :  { %v65_v29 = vpop.xlane.xlu1 %64 }
 0x1fe   :  { %vm66_vm8 = vcmp.eq.f32.partialorder %v63_v27, %v65_v29  ;;  %v71_v32 = vcvt.f32.s32 %v65_v29 }
 0x1ff   :  { %v67_v31 = vsel %vm66_vm8, %v62_v30, inf }
 0x200   :  { %68 = vmin.xlane.f32.xlu2 %v67_v31  ;;  %v72_v34 = vshll.u32 %v71_v32, 16 }
 0x273   :  { %v69_v33 = vpop.xlane.xlu2 %68 }
 0x274   :  { %v70_v35 = vcvt.f32.s32 %v69_v33 }
 0x276   :  { %v73_v36 = vadd.s32 %v72_v34, %v70_v35 }
 0x278   :  { %76 = vst.msk [vmem:[%s150_s2] sm:$0xff] %vm74_vm6, %v73_v36 }
 0x279   :  { %85 = vsyncpa [#allocation3], 1 }

</bundles_post_ra>
